<compile_context>
chip_gen: v5e
topology: v5e:2x2
jax: 0.10.0
libtpu: 0.0.40
codegen_flags: <defaults>
</compile_context>

<pallas_src>
import jax
import jax.numpy as jnp
from jax.experimental import pallas as pl
from jax.experimental.pallas import tpu as pltpu

# ----------------------------- config (small test shapes) --------------------
BATCH = 2
SEQ = 8
HIDDEN = 128          # multiple of 128 -> lane-dense loads/stores
LN_EPS = 1e-12


def bert_self_output_kernel(h_ref, x_ref, w_ref, p_ref, out_ref):
    # h_ref / x_ref: (tm, H) tile     w_ref: (H, H) resident
    # p_ref: (3, H) = [bias; gamma; beta] resident
    #
    # MXU matmul: operands in their stored dtype (bf16 fast path when inputs are
    # bf16), f32 accumulation via preferred_element_type.
    y = jnp.dot(h_ref[...], w_ref[...], preferred_element_type=jnp.float32)

    params = p_ref[...].astype(jnp.float32)
    bias = params[0:1, :]      # (1, H) -> broadcasts over rows
    gamma = params[1:2, :]
    beta = params[2:3, :]

    # bias + residual in f32 (dropout = identity in eval mode)
    y = y + bias + x_ref[...].astype(jnp.float32)

    # LayerNorm over the last dim (biased variance), all stats in f32
    mu = jnp.mean(y, axis=-1, keepdims=True)
    var = jnp.mean(jnp.square(y - mu), axis=-1, keepdims=True)
    out = (y - mu) * jax.lax.rsqrt(var + LN_EPS) * gamma + beta

    out_ref[...] = out.astype(out_ref.dtype)


def bert_self_output(hidden_states, input_tensor, weight, packed_params,
                     *, block_rows=512, alias_residual=False):
    """hidden_states, input_tensor: (B, S, H); weight: (H, H) pre-transposed
    (in_features, out_features); packed_params: (3, H) = [bias, ln_gamma, ln_beta].

    block_rows: row-tile size for the streamed M = B*S axis (rounded to the
    sublane alignment of the input dtype). alias_residual: reuse the residual
    input buffer as the output (only if the caller doesn't need input_tensor)."""
    B, S, H = hidden_states.shape
    BS = B * S
    dtype = hidden_states.dtype
    row_align = 16 if dtype == jnp.bfloat16 else 8

    h2 = hidden_states.reshape(BS, H)
    x2 = input_tensor.reshape(BS, H)

    # Row-tile size: multiple of the sublane alignment; single tile if BS is small.
    tm = max(row_align, (block_rows // row_align) * row_align)
    if BS <= tm:
        tm = ((BS + row_align - 1) // row_align) * row_align
    bs_pad = pl.cdiv(BS, tm) * tm
    if bs_pad != BS:
        pad = bs_pad - BS
        h2 = jnp.pad(h2, ((0, pad), (0, 0)))
        x2 = jnp.pad(x2, ((0, pad), (0, 0)))

    grid = (bs_pad // tm,)

    extra = {}
    if alias_residual:
        extra["input_output_aliases"] = {1: 0}   # residual buffer -> output

    out = pl.pallas_call(
        bert_self_output_kernel,
        out_shape=jax.ShapeDtypeStruct((bs_pad, H), dtype),
        grid=grid,
        in_specs=[
            pl.BlockSpec((tm, H), lambda i: (i, 0)),   # hidden_states tile (streamed)
            pl.BlockSpec((tm, H), lambda i: (i, 0)),   # residual tile (streamed)
            pl.BlockSpec((H, H), lambda i: (0, 0)),    # dense weight (resident)
            pl.BlockSpec((3, H), lambda i: (0, 0)),    # packed bias/gamma/beta (resident)
        ],
        out_specs=pl.BlockSpec((tm, H), lambda i: (i, 0)),
        compiler_params=pltpu.CompilerParams(
            dimension_semantics=("parallel",)),        # shard rows across TCs on v7x
        **extra,
    )(h2, x2, weight, packed_params)

    if bs_pad != BS:
        out = out[:BS]
    return out.reshape(B, S, H)


# --------------------------- pure-JAX reference -------------------------------
def bert_self_output_ref(hidden_states, input_tensor, weight, packed_params):
    bias, gamma, beta = packed_params[0], packed_params[1], packed_params[2]
    y = hidden_states @ weight + bias
    y = y + input_tensor
    mu = jnp.mean(y, axis=-1, keepdims=True)
    var = jnp.mean((y - mu) ** 2, axis=-1, keepdims=True)
    return (y - mu) / jnp.sqrt(var + LN_EPS) * gamma + beta


if __name__ == "__main__":
    key = jax.random.PRNGKey(0)
    k_h, k_x, k_w, k_b, k_g, k_be = jax.random.split(key, 6)

    hidden_states = jax.random.normal(k_h, (BATCH, SEQ, HIDDEN), jnp.float32)
    input_tensor = jax.random.normal(k_x, (BATCH, SEQ, HIDDEN), jnp.float32)

    # nn.Linear weight stored pre-transposed: y = x @ W + b
    weight = jax.random.normal(k_w, (HIDDEN, HIDDEN), jnp.float32) * 0.02
    bias = jax.random.normal(k_b, (HIDDEN,), jnp.float32) * 0.02
    gamma = 1.0 + 0.1 * jax.random.normal(k_g, (HIDDEN,), jnp.float32)
    beta = 0.1 * jax.random.normal(k_be, (HIDDEN,), jnp.float32)
    packed_params = jnp.stack([bias, gamma, beta], axis=0)  # (3, H)

    ref = bert_self_output_ref(hidden_states, input_tensor, weight, packed_params)

    # f32 path; block_rows=8 forces a 2-step pipelined grid even at this toy size.
    out = bert_self_output(hidden_states, input_tensor, weight, packed_params,
                           block_rows=8)
    out = jax.block_until_ready(out)
    assert out.shape == (BATCH, SEQ, HIDDEN)
    assert jnp.allclose(out, ref, rtol=1e-5, atol=1e-5), "f32 mismatch vs reference"

    # bf16 MXU-operand path (f32 accumulation + f32 LayerNorm inside the kernel).
    out_bf16 = bert_self_output(hidden_states.astype(jnp.bfloat16),
                                input_tensor.astype(jnp.bfloat16),
                                weight.astype(jnp.bfloat16),
                                packed_params)
    out_bf16 = jax.block_until_ready(out_bf16)
    assert jnp.allclose(out_bf16.astype(jnp.float32), ref, rtol=5e-2, atol=5e-2), \
        "bf16 mismatch vs reference"

    print("KERNEL_OK")
</pallas_src>

<mosaic_0001>
module attributes {stable_mosaic.version = 11 : i64} {
  func.func @bert_self_output_kernel(%arg0: i32, %arg1: memref<8x128xf32, #tpu.memory_space<vmem>>, %arg2: memref<8x128xf32, #tpu.memory_space<vmem>>, %arg3: memref<128x128xf32, #tpu.memory_space<vmem>>, %arg4: memref<3x128xf32, #tpu.memory_space<vmem>>, %arg5: memref<8x128xf32, #tpu.memory_space<vmem>>) attributes {dimension_semantics = [#tpu.dimension_semantics<parallel>], iteration_bounds = array<i64: 2>, scalar_prefetch = 0 : i64, scratch_operands = 0 : i64, tpu.core_type = #tpu.core_type<tc>, window_params = [{transform_indices = @transform_0, window_bounds = array<i64: 8, 128>}, {transform_indices = @transform_1, window_bounds = array<i64: 8, 128>}, {pipeline_mode = #tpu.pipeline_mode<synchronous>, transform_indices = @transform_2, window_bounds = array<i64: 128, 128>}, {pipeline_mode = #tpu.pipeline_mode<synchronous>, transform_indices = @transform_3, window_bounds = array<i64: 3, 128>}, {transform_indices = @transform_4, window_bounds = array<i64: 8, 128>}]} {
    %c0 = arith.constant 0 : index
    %c0_0 = arith.constant 0 : index
    %0 = vector.load %arg1[%c0, %c0_0] : memref<8x128xf32, #tpu.memory_space<vmem>>, vector<8x128xf32>
    %c0_1 = arith.constant 0 : index
    %c0_2 = arith.constant 0 : index
    %1 = vector.load %arg3[%c0_1, %c0_2] : memref<128x128xf32, #tpu.memory_space<vmem>>, vector<128x128xf32>
    %cst = arith.constant dense<0.000000e+00> : vector<8x128xf32>
    %2 = tpu.matmul %0, %1, %cst {dimension_numbers = #tpu.dot_dimension_numbers<[1], [0], [0], [1], [0, 0, 1, 1], [], []>} : vector<8x128xf32>, vector<128x128xf32>, vector<8x128xf32> -> vector<8x128xf32>
    %c0_3 = arith.constant 0 : index
    %c0_4 = arith.constant 0 : index
    %3 = vector.load %arg4[%c0_3, %c0_4] : memref<3x128xf32, #tpu.memory_space<vmem>>, vector<3x128xf32>
    %4 = vector.extract_strided_slice %3 {offsets = [0, 0], sizes = [1, 128], strides = [1, 1]} : vector<3x128xf32> to vector<1x128xf32>
    %5 = vector.extract_strided_slice %3 {offsets = [1, 0], sizes = [1, 128], strides = [1, 1]} : vector<3x128xf32> to vector<1x128xf32>
    %6 = vector.extract_strided_slice %3 {offsets = [2, 0], sizes = [1, 128], strides = [1, 1]} : vector<3x128xf32> to vector<1x128xf32>
    %7 = vector.broadcast %4 : vector<1x128xf32> to vector<8x128xf32>
    %8 = arith.addf %2, %7 : vector<8x128xf32>
    %c0_5 = arith.constant 0 : index
    %c0_6 = arith.constant 0 : index
    %9 = vector.load %arg2[%c0_5, %c0_6] : memref<8x128xf32, #tpu.memory_space<vmem>>, vector<8x128xf32>
    %10 = arith.addf %8, %9 : vector<8x128xf32>
    %cst_7 = arith.constant dense<0.000000e+00> : vector<8xf32>
    %11 = vector.multi_reduction <add>, %10, %cst_7 [1] : vector<8x128xf32> to vector<8xf32>
    %12 = vector.shape_cast %11 : vector<8xf32> to vector<8x1xf32>
    %cst_8 = arith.constant 1.280000e+02 : f32
    %13 = vector.broadcast %cst_8 : f32 to vector<8x1xf32>
    %14 = arith.divf %12, %13 : vector<8x1xf32>
    %15 = vector.broadcast %14 : vector<8x1xf32> to vector<8x128xf32>
    %16 = arith.subf %10, %15 : vector<8x128xf32>
    %17 = arith.mulf %16, %16 : vector<8x128xf32>
    %cst_9 = arith.constant dense<0.000000e+00> : vector<8xf32>
    %18 = vector.multi_reduction <add>, %17, %cst_9 [1] : vector<8x128xf32> to vector<8xf32>
    %19 = vector.shape_cast %18 : vector<8xf32> to vector<8x1xf32>
    %cst_10 = arith.constant 1.280000e+02 : f32
    %20 = vector.broadcast %cst_10 : f32 to vector<8x1xf32>
    %21 = arith.divf %19, %20 : vector<8x1xf32>
    %22 = vector.broadcast %14 : vector<8x1xf32> to vector<8x128xf32>
    %23 = arith.subf %10, %22 : vector<8x128xf32>
    %cst_11 = arith.constant 9.99999996E-13 : f32
    %24 = vector.broadcast %cst_11 : f32 to vector<8x1xf32>
    %25 = arith.addf %21, %24 : vector<8x1xf32>
    %26 = math.rsqrt %25 : vector<8x1xf32>
    %27 = vector.broadcast %26 : vector<8x1xf32> to vector<8x128xf32>
    %28 = arith.mulf %23, %27 : vector<8x128xf32>
    %29 = vector.broadcast %5 : vector<1x128xf32> to vector<8x128xf32>
    %30 = arith.mulf %28, %29 : vector<8x128xf32>
    %31 = vector.broadcast %6 : vector<1x128xf32> to vector<8x128xf32>
    %32 = arith.addf %30, %31 : vector<8x128xf32>
    %c0_12 = arith.constant 0 : index
    %c0_13 = arith.constant 0 : index
    %33 = vector.load %arg5[%c0_12, %c0_13] : memref<8x128xf32, #tpu.memory_space<vmem>>, vector<8x128xf32>
    tpu.vector_store %arg5[%c0_12, %c0_13], %32 {strides = array<i32>} : memref<8x128xf32, #tpu.memory_space<vmem>>, vector<8x128xf32>,
    return
  }
  func.func @transform_0(%arg0: i32) -> (i32, i32) {
    %c0_i32 = arith.constant 0 : i32
    %c0_i32_0 = arith.constant 0 : i32
    return %arg0, %c0_i32 : i32, i32
  }
  func.func @transform_1(%arg0: i32) -> (i32, i32) {
    %c0_i32 = arith.constant 0 : i32
    %c0_i32_0 = arith.constant 0 : i32
    return %arg0, %c0_i32 : i32, i32
  }
  func.func @transform_2(%arg0: i32) -> (i32, i32) {
    %c0_i32 = arith.constant 0 : i32
    %c0_i32_0 = arith.constant 0 : i32
    %c0_i32_1 = arith.constant 0 : i32
    return %c0_i32, %c0_i32_0 : i32, i32
  }
  func.func @transform_3(%arg0: i32) -> (i32, i32) {
    %c0_i32 = arith.constant 0 : i32
    %c0_i32_0 = arith.constant 0 : i32
    %c0_i32_1 = arith.constant 0 : i32
    return %c0_i32, %c0_i32_0 : i32, i32
  }
  func.func @transform_4(%arg0: i32) -> (i32, i32) {
    %c0_i32 = arith.constant 0 : i32
    %c0_i32_0 = arith.constant 0 : i32
    return %arg0, %c0_i32 : i32, i32
  }
}

</mosaic_0001>

<bundles_post_ra>
// kernel: tpu_custom_call.1
= control target key start
LH: loop header
LB: loop body
LE: loop exit
PB: predicated region body
PF: predicated region fallthrough
CT: control target
= control target key end

     0   :  { %s999_s0 = inlined_call_operand.hbm [shape: f32[16,128], index: 0, kind: input, shape index: {}]   ;;  %s1000_s1 = inlined_call_operand.hbm [shape: f32[16,128], index: 1, kind: input, shape index: {}]   ;;  %s1001_s2 = inlined_call_operand.hbm [shape: f32[128,128], index: 2, kind: input, shape index: {}]   ;;  %s1002_s3 = inlined_call_operand.hbm [shape: f32[3,128], index: 3, kind: input, shape index: {}]   ;;  %s1003_s4 = inlined_call_operand.hbm [shape: f32[16,128], index: 4, kind: output, shape index: {}]  }
   0x1   :  { %1004 = sst [smem:[#allocation17_spill]] %s1001_s2 }
   0x2   :  { %1005 = sst [smem:[#allocation18_spill]] %s1002_s3 }
   0x3   :  { %9 = vsyncpa [#allocation3], 0 }
   0x4   :  { %11 = vsyncpa [#allocation3 + $0x1], 0 }
   0x5   :  { %12 = vsyncpa [#allocation6], 0 }
   0x6   :  { %14 = vsyncpa [#allocation6 + $0x1], 0 }
   0x7   :  { %15 = vsyncpa [#allocation9], 0 }
   0x8   :  { %16 = vsyncpa [#allocation4], 0 }
   0x9   :  { %18 = vsyncpa [#allocation4 + $0x1], 0  ;;  %s814_s15 = smov 0   ;;  %s816_s16 = smov 0  }
   0xa   :  { %s818_s17 = smov 0   ;;  %s820_s18 = smov 0  }
   0xb LB: > { %s1006_s2 = sld [smem:[#allocation17_spill]]  ;;  %s838_s22 = sadd.s32 4294967295, %s782_s18   ;;  %s782_s18 = sphi %s820_s18, %s1020_s18   ;;  %s778_s17 = sphi %s818_s17, %s1019_s17   ;;  %s774_s16 = sphi %s816_s16, %s1018_s16   ;;  %s770_s15 = sphi %s814_s15, %s1017_s15  }
   0xc   : > { %p487_p0 = scmp.ge.s32.totalorder %s782_s18, 1  ;;  %p45_p1 = scmp.eq.s32.totalorder %s838_s22, 0 }
   0xd   : > { %p149_p2 = scmp.lt.s32.totalorder %s782_s18, 3  ;;  %s784_s24 = smov [#allocation7]  }
   0xe   : > { %s162_s25 = sshll.u32 %s784_s24, 4  ;;  %s1008_s3 = sld [smem:[#allocation18_spill]]  ;;  %s163_s25 = int_to_ptr.vmem [resolvable:$true] %s162_s25 }
   0xf   : > { %p843_p3 = pnand %p487_p0, %p149_p2  ;;  %s785_s29 = smov [#allocation8]  }
  0x10   : > { %s177_s30 = sshll.u32 %s785_s29, 4  ;;  %s786_s5 = smov 128   ;;  %s178_s30 = int_to_ptr.vmem [resolvable:$true] %s177_s30 }
  0x11   : > { %s160_s21 = sshll.u32 %s1006_s2, 4  ;;  %p519_p4 = pneg %p843_p3  ;;  %s161_s21 = int_to_ptr.hbm [resolvable:$true] %s160_s21 }
  0x12   : > { %s787_s6 = smov 8   ;;  %s486_s7 = sadd.s32 4294967294, %s782_s18  }
  0x13   : > { %p520_p6 = pnand %p519_p4, %p45_p1  ;;  %s857_s8 = sadd.s32 1, %s782_s18  }
  0x14   : > { %s175_s28 = sshll.u32 %s1008_s3, 4  ;;  %s28_s9 = ssub.s32 %s782_s18, %s857_s8  ;;  %s176_s28 = int_to_ptr.hbm [resolvable:$true] %s175_s28 }
  0x15   : > { %522 = dma.hbm_to_vmem [thread:$0]  (!%p520_p6), %s161_s21, 2048, %s163_s25, [#allocation6], %s786_s5, %s786_s5, %s787_s6  }
  0x16   : > { %525 = dma.hbm_to_vmem [thread:$0]  (!%p520_p6), %s176_s28, 64, %s178_s30, [#allocation9]  }
  0x17   : > { %s31_s10 = sadd.s32 1, %s778_s17  ;;  %p29_p7 = scmp.eq.s32.totalorder %s28_s9, 0 }
  0x18   : > { %p38_p8 = scmp.ne.s32.totalorder %s778_s17, %s774_s16  ;;  %p39_p9 = scmp.eq.s32.totalorder %s782_s18, 0 }
  0x19   : > { %p44_p10 = scmp.ne.s32.totalorder %s774_s16, %s770_s15  ;;  %p136_p13 = scmp.eq.s32.totalorder %s838_s22, 1 }
  0x1a   : > { %s868_s11 = scalar_select %p29_p7, %s778_s17, %s31_s10  }
  0x1b   : > { %p870_p11 = por %p39_p9, %p38_p8  ;;  %p876_p12 = por %p45_p1, %p44_p10 }
  0x1c   : > { %1009 = sst [smem:[#allocation16_spill]] %s868_s11  ;;  %p142_p0 = scmp.eq.s32.totalorder %s486_s7, 1 }
  0x1d   : > { %p539_p2 = scmp.lt.s32.totalorder %s782_s18, 2  ;;  %s188_s14 = sand.u32 1, %s778_s17  }
  0x1e   : > { %p883_p4 = por %p136_p13, %p38_p8  ;;  %p887_p6 = por %p142_p0, %p44_p10 }
  0x1f   : > { %s891_s21 = sshll.u32 %s188_s14, 3  ;;  %s492_s24 = sshll.u32 %s782_s18, 3 }
  0x20   : > { %s196_s27 = scalar_lea.hbm %s999_s0, %s492_s24  ;;  %s192_s28 = scalar_lea.vmem [#allocation2], %s891_s21 }
  0x21   : > { %s200_s29 = sshll.u32 %s192_s28, 4  ;;  %s198_s30 = sshll.u32 %s196_s27, 4  ;;  %s201_s29 = int_to_ptr.vmem [resolvable:$true] %s200_s29  ;;  %s199_s30 = int_to_ptr.hbm [resolvable:$true] %s198_s30 }
  0x22   : > { %p900_p7 = pnand %p539_p2, %p870_p11  ;;  %s215_s9 = scalar_lea.hbm %s1000_s1, %s492_s24 }
  0x23   : > { %s207_s10 = sand.u32 1, %s782_s18   ;;  %s189_s2 = scalar_lea.sflag [#allocation3], %s188_s14 }
  0x24   : > { %s644_s25 = sshra.s32 %s199_s30, 4  ;;  %p648_p9 = pneg %p900_p7  ;;  %s645_s25 = int_to_ptr.hbm [resolvable:$true] %s644_s25 }
  0x25   : > { %s646_s26 = scalar_lea.hbm %s645_s25, 8  ;;  %s651_s28 = scalar_lea.hbm %s999_s0, 16 }
  0x26   : > { %p647_p8 = scmp.ne.s32.totalorder %s645_s25, %s646_s26  ;;  %p652_p13 = scmp.lt.s32.totalorder %s645_s25, %s999_s0 }
  0x27   : > { %p653_p0 = scmp.lt.s32.totalorder %s651_s28, %s646_s26 }
  0x28   : > { %p649_p10 = pnand %p648_p9, %p647_p8 }
  0x29   : > { %p654_p2 = por %p653_p0, %p652_p13 }
  0x2a   : > { %p650_p11 = pneg %p649_p10 }
  0x2c   : > { %p655_p5 = pnand %p654_p2, %p650_p11 }
  0x2e   : > { %658 = shalt.err (!%p655_p5)
}
  0x2f   : > { %529 = dma.hbm_to_vmem [thread:$0]  (!%p900_p7), %s199_s30, 128, %s201_s29, %s189_s2  }
  0x30   : > { %s217_s14 = sshll.u32 %s215_s9, 4  ;;  %s211_s24 = scalar_lea.vmem [#allocation5], %s891_s21  ;;  %s218_s14 = int_to_ptr.hbm [resolvable:$true] %s217_s14 }
  0x31   : > { %s219_s3 = sshll.u32 %s211_s24, 4  ;;  %s208_s12 = scalar_lea.sflag [#allocation6], %s207_s10  ;;  %s220_s3 = int_to_ptr.vmem [resolvable:$true] %s219_s3 }
  0x32   : > { %s674_s27 = sshra.s32 %s218_s14, 4  ;;  %s681_s28 = scalar_lea.hbm %s1000_s1, 16  ;;  %s675_s27 = int_to_ptr.hbm [resolvable:$true] %s674_s27 }
  0x33   : > { %s676_s11 = scalar_lea.hbm %s675_s27, 8  ;;  %p682_p5 = scmp.lt.s32.totalorder %s675_s27, %s1000_s1 }
  0x34   : > { %p677_p8 = scmp.ne.s32.totalorder %s675_s27, %s676_s11  ;;  %p683_p13 = scmp.lt.s32.totalorder %s681_s28, %s676_s11 }
  0x36   : > { %p679_p10 = pnand %p677_p8, %p648_p9  ;;  %p684_p0 = por %p683_p13, %p682_p5 }
  0x38   : > { %p680_p11 = pneg %p679_p10 }
  0x3a   : > { %p685_p2 = pnand %p684_p0, %p680_p11 }
  0x3c   : > { %688 = shalt.err (!%p685_p2)
}
  0x3d   : > { %532 = dma.hbm_to_vmem [thread:$0]  (!%p900_p7), %s218_s14, 128, %s220_s3, %s208_s12  }
  0x3e   : > { %228 = sbr.rel (%p843_p3) target bundleno = 506 (0x1fa), region = 36  ;;  %s936_s21 = sand.u32 (!%p843_p3), 1, %s774_s16  }
  0x3f   : > { %s939_s29 = sshll.u32 (!%p843_p3), %s936_s21, 3  ;;  %s231_s30 = scalar_lea.sflag (!%p843_p3), [#allocation3], %s936_s21 }
  0x40   : > { %s234_s11 = scalar_lea.vmem (!%p843_p3), [#allocation2], %s939_s29 }
  0x43   : > { %749 = dma.done.wait (%p876_p12), %s231_s30, 128  }
  0x44   : > { %751 = vsyncadd (%p876_p12), %s231_s30, 4294967168  ;;  %s240_s3 = sand.u32 1, %s838_s22   ;;  %s244_s5 = scalar_lea.vmem [#allocation5], %s939_s29 }
  0x45   : > { %s241_s23 = scalar_lea.sflag [#allocation6], %s240_s3 }
  0x46   : > { %753 = dma.done.wait (%p876_p12), %s241_s23, 128  }
  0x47   : > { %755 = vsyncadd (%p876_p12), %s241_s23, 4294967168 }
  0x48   : > { %757 = dma.done.wait (%p45_p1), [#allocation6], 2048  }
  0x49   : > { %759 = vsyncadd (%p45_p1), [#allocation6], 4294965248 }
  0x4a   : > { %761 = dma.done.wait (%p45_p1), [#allocation9], 64  }
  0x4b   : > { %763 = vsyncadd (%p45_p1), [#allocation9], 4294967232  ;;  %v301_v0 = vld [vmem:[#allocation7 + $0x78] sm:$0xff]  ;;  %v300_v1 = vld [vmem:[#allocation7 + $0x70] sm:$0xff]  ;;  %v788_v23 = vmov 128.0   ;;  %s502_s13 = sshll.u32 %s838_s22, 3 }
  0x4c   : > { %304 = vmatpush.msra.mxu0 %v301_v0  ;;  %v299_v2 = vld [vmem:[#allocation7 + $0x68] sm:$0xff]  ;;  %v298_v3 = vld [vmem:[#allocation7 + $0x60] sm:$0xff]  ;;  %v297_v4 = vld [vmem:[#allocation7 + $0x58] sm:$0xff]  ;;  %580 = vrcp.f32 %v788_v23  ;;  %s369_s7 = scalar_lea.hbm %s1003_s4, %s502_s13  ;;  %s284_s14 = scalar_lea.vmem [#allocation10], %s939_s29 }
  0x4d   : > { %v296_v5 = vld [vmem:[#allocation7 + $0x50] sm:$0xff]  ;;  %v295_v6 = vld [vmem:[#allocation7 + $0x48] sm:$0xff]  ;;  %v294_v7 = vld [vmem:[#allocation7 + $0x40] sm:$0xff]  ;;  %s371_s24 = sshll.u32 %s284_s14, 4  ;;  %s373_s12 = sshll.u32 %s369_s7, 4  ;;  %s372_s24 = int_to_ptr.vmem [resolvable:$true] %s371_s24  ;;  %s374_s12 = int_to_ptr.hbm [resolvable:$true] %s373_s12 }
  0x4e   : > { %305 = vmatpush.msra.mxu0 %v300_v1  ;;  %v293_v8 = vld [vmem:[#allocation7 + $0x38] sm:$0xff]  ;;  %v292_v9 = vld [vmem:[#allocation7 + $0x30] sm:$0xff]  ;;  %v291_v10 = vld [vmem:[#allocation7 + $0x28] sm:$0xff]  ;;  %s359_s22 = scalar_lea.sflag [#allocation4], %s936_s21  ;;  %s718_s27 = sshra.s32 %s374_s12, 4  ;;  %s719_s27 = int_to_ptr.hbm [resolvable:$true] %s718_s27 }
  0x4f   : > { %v290_v11 = vld [vmem:[#allocation7 + $0x20] sm:$0xff]  ;;  %v289_v12 = vld [vmem:[#allocation7 + $0x18] sm:$0xff]  ;;  %v288_v13 = vld [vmem:[#allocation7 + $0x10] sm:$0xff]  ;;  %s720_s25 = scalar_lea.hbm %s719_s27, 8  ;;  %s724_s6 = scalar_lea.hbm %s1003_s4, 16 }
  0x50   : > { %306 = vmatpush.msra.mxu0 %v299_v2  ;;  %v287_v14 = vld [vmem:[#allocation7 + $0x8] sm:$0xff]  ;;  %v286_v15 = vld [vmem:[#allocation7] sm:$0xff]  ;;  %v324_v20 = vld [vmem:[%s244_s5] sm:$0xff]  ;;  %p721_p1 = scmp.ne.s32.totalorder %s719_s27, %s720_s25  ;;  %p725_p7 = scmp.lt.s32.totalorder %s719_s27, %s1003_s4 }
  0x51   : > { %v285_v16 = vld [vmem:[%s234_s11] sm:$0xff]  ;;  %p726_p9 = scmp.lt.s32.totalorder %s724_s6, %s720_s25 }
  0x52   : > { %307 = vmatpush.msra.mxu0 %v298_v3  ;;  %v302_v17 = vld [vmem:[#allocation8] sm:$0x7]  ;;  %v581_v24 = vpop.eup %580  ;;  %p722_p3 = pnand %p721_p1, %p883_p4 }
  0x53   : > { %v303_v18 = vperm.slane %v302_v17, 0  ;;  %v329_v25 = vmul.f32 128.0, %v581_v24  ;;  %vm333_vm0 = vweird.f32 %v581_v24  ;;  %v353_v43 = vperm.slane %v302_v17, 1  ;;  %p727_p8 = por %p726_p9, %p725_p7 }
  0x54   : > { %308 = vmatpush.msra.mxu0 %v297_v4  ;;  %v355_v45 = vperm.slane %v302_v17, 2  ;;  %p723_p12 = pneg %p722_p3 }
  0x55   : > { %v330_v26 = vsub.f32 1.0, %v329_v25 }
  0x56   : > { %309 = vmatpush.msra.mxu0 %v296_v5  ;;  %p728_p10 = pnand %p727_p8, %p723_p12 }
  0x57   : > { %v331_v27 = vmul.f32 %v581_v24, %v330_v26 }
  0x58   : > { %310 = vmatpush.msra.mxu0 %v295_v6 }
  0x59   : > { %v332_v28 = vadd.f32 %v581_v24, %v331_v27 }
  0x5a   : > { %311 = vmatpush.msra.mxu0 %v294_v7 }
  0x5b   : > { %v334_v29 = vsel %vm333_vm0, %v581_v24, %v332_v28 }
  0x5c   : > { %312 = vmatpush.msra.mxu0 %v293_v8 }
  0x5e   : > { %313 = vmatpush.msra.mxu0 %v292_v9 }
  0x60   : > { %314 = vmatpush.msra.mxu0 %v291_v10 }
  0x62   : > { %315 = vmatpush.msra.mxu0 %v290_v11 }
  0x64   : > { %316 = vmatpush.msra.mxu0 %v289_v12 }
  0x66   : > { %317 = vmatpush.msra.mxu0 %v288_v13 }
  0x68   : > { %318 = vmatpush.msra.mxu0 %v287_v14 }
  0x6a   : > { %319 = vmatpush.msra.mxu0 %v286_v15 }
  0x6b   : > { %320 = vmatmul.f32.vlgmr.msra.gmra.mxu0 %v285_v16 }
  0xe8   : > { %v321_v19 = vpop.f32.mrf.mxu0 }
  0xe9   : > { %v322_v21 = vadd.f32 %v321_v19, %v303_v18 }
  0xeb   : > { %v325_v22 = vadd.f32 %v324_v20, %v322_v21 }
  0xed   : > { %326 = vadd.xlane.f32.xlu0 %v325_v22 }
 0x160   : > { %v327_v30 = vpop.xlane.xlu0 %326 }
 0x161   : > { %v335_v31 = vmul.f32 %v334_v29, %v327_v30 }
 0x163   : > { %v336_v32 = vsub.f32 %v325_v22, %v335_v31 }
 0x165   : > { %v337_v33 = vmul.f32 %v336_v32, %v336_v32 }
 0x167   : > { %338 = vadd.xlane.f32.xlu0 %v337_v33 }
 0x1da   : > { %v339_v34 = vpop.xlane.xlu0 %338 }
 0x1db   : > { %v340_v35 = vmul.f32 %v339_v34, %v334_v29 }
 0x1dd   : > { %v341_v36 = vadd.f32 1e-12, %v340_v35 }
 0x1df   : > { %582 = vrsqrt.f32 %v341_v36  ;;  %vm348_vm2 = vweird.f32 %v341_v36 }
 0x1e5   : > { %v583_v37 = vpop.eup %582 }
 0x1e6   : > { %v343_v38 = vmul.f32 %v583_v37, %v341_v36  ;;  %vm349_vm1 = vweird.f32 %v583_v37 }
 0x1e7   : > { %vm350_vm3 = vmor %vm348_vm2, %vm349_vm1 }
 0x1e8   : > { %v344_v39 = vmul.f32 %v583_v37, %v343_v38 }
 0x1ea   : > { %v345_v40 = vmul.f32 0.5, %v344_v39 }
 0x1ec   : > { %v346_v41 = vsub.f32 1.5, %v345_v40 }
 0x1ee   : > { %v347_v42 = vmul.f32 %v583_v37, %v346_v41 }
 0x1f0   : > { %v351_v44 = vsel %vm350_vm3, %v583_v37, %v347_v42 }
 0x1f1   : > { %v352_v46 = vmul.f32 %v351_v44, %v336_v32 }
 0x1f3   : > { %v354_v47 = vmul.f32 %v353_v43, %v352_v46 }
 0x1f5   : > { %v356_v48 = vadd.f32 %v355_v45, %v354_v47 }
 0x1f7   : > { %357 = vst [vmem:[%s284_s14] sm:$0xff] %v356_v48 }
 0x1f8   : > { %731 = shalt.err (!%p728_p10)
}
 0x1f9   : > { %517 = dma.vmem_to_hbm [thread:$0]  (%p883_p4), %s372_s24, 128, %s374_s12, %s359_s22  }
 0x1fa PF: > { %s385_s21 = sand.u32 1, %s770_s15   ;;  %p1015_p11 = scmp.ge.s32.totalorder %s782_s18, 2 }
 0x1fb   : > { %s386_s30 = scalar_lea.sflag [#allocation4], %s385_s21 }
 0x1fc   : > { %p534_p5 = pnand %p1015_p11, %p887_p6 }
 0x1fe   : > { %p535_p13 = pneg %p534_p5 }
 0x200   : > { %765 = dma.done.wait (%p535_p13), %s386_s30, 128  }
 0x201   : > { %767 = vsyncadd (%p535_p13), %s386_s30, 4294967168  ;;  %s1016_s11 = sld [smem:[#allocation16_spill]]  ;;  %p21_p0 = scmp.ge.s32.totalorder %s857_s8, 4  }
 0x202   : > { %s1017_s15 = smov %s774_s16  ;;  %s1018_s16 = smov %s778_s17 }
 0x203   : > { %s1020_s18 = smov %s857_s8  ;;  %23 = sbr.rel (!%p21_p0) target bundleno = 11 (0xb), region = 102 }
 0x207   : > { %s1019_s17 = smov %s1016_s11 }
 0x208   :  { %392 = vsyncpa [#allocation3], 1 }
 0x209   :  { %394 = vsyncpa [#allocation3 + $0x1], 1 }
 0x20a   :  { %395 = vsyncpa [#allocation6], 1 }
 0x20b   :  { %397 = vsyncpa [#allocation6 + $0x1], 1 }
 0x20c   :  { %398 = vsyncpa [#allocation9], 1 }
 0x20d   :  { %399 = vsyncpa [#allocation4], 1 }
 0x20e   :  { %401 = vsyncpa [#allocation4 + $0x1], 1 }

</bundles_post_ra>
